<compile_context>
chip_gen: v7x
topology: tpu7x:2x2x1
jax: 0.10.0
libtpu: 0.0.40
codegen_flags: <defaults>
</compile_context>

<pallas_src>
import functools

import jax
import jax.numpy as jnp
import numpy as np
from jax.experimental import pallas as pl
from jax.experimental.pallas import tpu as pltpu


# ----------------------------------------------------------------------------
# Kernel: fused 6-layer MLP on one (features, batch) tile
# ----------------------------------------------------------------------------
def deepnn_kernel(
    x_ref,            # (1, tm)     f32, batch on lanes
    w1_ref, b1_ref,   # (128, 1) f32, (128, 1) f32
    w2_ref, b2_ref,   # (128, 128) bf16, (128, 1) f32
    w3_ref, b3_ref,   # (64, 128)  bf16, (64, 1)  f32
    w4_ref, b4_ref,   # (64, 64)   bf16, (64, 1)  f32
    w5_ref, b5_ref,   # (32, 64)   bf16, (32, 1)  f32
    w6_ref, b6_ref,   # (32, 1)  f32, (1, 1) f32
    o_ref,            # (1, tm)     f32
):
    x = x_ref[...]                                            # (1, tm) f32

    # Layer 1, Linear(1,128): K=1 is degenerate on the MXU -> VPU broadcast
    # outer product, exact f32.
    h = jnp.maximum(w1_ref[...] * x + b1_ref[...], 0.0)       # (128, tm) f32

    # Layers 2..5: (out,in) @ (in,tm) on the MXU; batch stays lane-dense.
    # Weights are stored bf16; cast the activation operand to match and
    # accumulate in f32 (numerically equivalent to default-precision f32 dots).
    def mxu_layer(h, w_ref, b_ref):
        y = jnp.dot(w_ref[...], h.astype(w_ref.dtype),
                    preferred_element_type=jnp.float32)
        return jnp.maximum(y + b_ref[...], 0.0)

    h = mxu_layer(h, w2_ref, b2_ref)   # (128, tm)
    h = mxu_layer(h, w3_ref, b3_ref)   # (64,  tm)
    h = mxu_layer(h, w4_ref, b4_ref)   # (64,  tm)
    h = mxu_layer(h, w5_ref, b5_ref)   # (32,  tm)

    # Layer 6, Linear(32,1): N=1 is degenerate on the MXU -> elementwise
    # multiply + 32-deep sublane reduction, exact f32.
    y = jnp.sum(w6_ref[...] * h, axis=0, keepdims=True) + b6_ref[...]  # (1, tm)

    o_ref[...] = y.astype(o_ref.dtype)


# ----------------------------------------------------------------------------
# Wrapper-side layout plumbing
# ----------------------------------------------------------------------------
def _round_up(n, m):
    return ((n + m - 1) // m) * m


def pack_params(params, mxu_dtype=jnp.bfloat16):
    """params: torch convention [(W (out,in), b (out,))].
    Returns the kernel-layout parameter list (no zero padding)."""
    (w1, b1), (w2, b2), (w3, b3), (w4, b4), (w5, b5), (w6, b6) = params

    def col(b):
        return b.reshape(-1, 1).astype(jnp.float32)

    return [
        w1.reshape(128, 1).astype(jnp.float32), col(b1),   # layer 1 (VPU)
        w2.astype(mxu_dtype), col(b2),                     # (128,128)
        w3.astype(mxu_dtype), col(b3),                     # (64,128)
        w4.astype(mxu_dtype), col(b4),                     # (64,64)
        w5.astype(mxu_dtype), col(b5),                     # (32,64)
        w6.reshape(-1, 1).astype(jnp.float32),             # (32,1)  layer 6 (VPU/XLU)
        b6.reshape(1, 1).astype(jnp.float32),
    ]


@functools.partial(jax.jit, static_argnames=("tm",))
def deepnn_forward(x, params, *, tm=4096):
    """x: (N, 1) float32.  params: torch-convention list of (W (out,in), b (out,))."""
    N, F = x.shape
    assert F == 1

    # Transpose to (features, batch) so the batch rides the 128-wide lane axis.
    x_t = x.reshape(1, N)

    # Batch tiling: pick the number of tiles first, then the smallest
    # 128-aligned tile that covers N with it -> padding waste < 128 rows/tile.
    # Force >=2 grid steps when there is enough work so v7x's two TensorCores
    # both get tiles under dimension_semantics=("parallel",).
    tm = max(int(tm), 128)
    min_steps = min(2, pl.cdiv(N, 128))
    num_tiles = max(pl.cdiv(N, tm), min_steps, 1)
    tm_eff = _round_up(pl.cdiv(N, num_tiles), 128)
    n_pad = tm_eff * num_tiles
    if n_pad != N:
        x_t = jnp.pad(x_t, ((0, 0), (0, n_pad - N)))

    packed = pack_params(params)

    # Constant weights/biases: whole-array VMEM residents (no per-step
    # re-DMA, no double buffering).
    const_spec = pl.BlockSpec(memory_space=pltpu.MemorySpace.VMEM)
    in_specs = [pl.BlockSpec((1, tm_eff), lambda i: (0, i))]
    in_specs += [const_spec] * len(packed)
    out_spec = pl.BlockSpec((1, tm_eff), lambda i: (0, i))

    param_bytes = int(sum(p.size * p.dtype.itemsize for p in packed))
    macs_per_row = 1 * 128 + 128 * 128 + 128 * 64 + 64 * 64 + 64 * 32 + 32 * 1
    cost = pl.CostEstimate(
        flops=2 * macs_per_row * n_pad,
        transcendentals=0,
        bytes_accessed=8 * n_pad + param_bytes,
    )

    y_t = pl.pallas_call(
        deepnn_kernel,
        out_shape=jax.ShapeDtypeStruct((1, n_pad), jnp.float32),
        grid_spec=pltpu.PrefetchScalarGridSpec(
            num_scalar_prefetch=0,
            grid=(num_tiles,),
            in_specs=in_specs,
            out_specs=out_spec,
        ),
        compiler_params=pltpu.CompilerParams(
            dimension_semantics=("parallel",),
            vmem_limit_bytes=32 * 1024 * 1024,
        ),
        cost_estimate=cost,
    )(x_t, *packed)

    # Slice off batch padding and return PyTorch-layout (N, 1).
    return y_t[:, :N].reshape(N, 1)


# ----------------------------------------------------------------------------
# Deterministic parameter init (PyTorch Linear default: U(-1/sqrt(fan_in), +))
# Torch convention: W is (out_features, in_features), b is (out_features,)
# ----------------------------------------------------------------------------
def init_params(key):
    dims = [1, 128, 128, 64, 64, 32, 1]
    params = []
    for i in range(len(dims) - 1):
        fan_in, fan_out = dims[i], dims[i + 1]
        key, kw, kb = jax.random.split(key, 3)
        bound = 1.0 / jnp.sqrt(jnp.float32(fan_in))
        w = jax.random.uniform(kw, (fan_out, fan_in), jnp.float32, -bound, bound)
        b = jax.random.uniform(kb, (fan_out,), jnp.float32, -bound, bound)
        params.append((w, b))
    return params


# References -----------------------------------------------------------------
def reference_forward_mimic(x, params):
    """JAX reference that mirrors the kernel arithmetic exactly
    (f32 layers 1/6, bf16-operand f32-accumulating dots for layers 2-5)."""
    (w1, b1), (w2, b2), (w3, b3), (w4, b4), (w5, b5), (w6, b6) = params
    h = jnp.maximum(x * w1.reshape(1, -1) + b1, 0.0)
    for (w, b) in [(w2, b2), (w3, b3), (w4, b4), (w5, b5)]:
        y = jnp.dot(h.astype(jnp.bfloat16), w.T.astype(jnp.bfloat16),
                    preferred_element_type=jnp.float32) + b
        h = jnp.maximum(y, 0.0)
    return jnp.sum(h * w6.reshape(1, -1), axis=1, keepdims=True) + b6


def reference_forward_f64(x, params):
    """Gold-standard float64 numpy reference."""
    h = np.asarray(x, np.float64)
    for i, (w, b) in enumerate(params):
        w = np.asarray(w, np.float64)
        b = np.asarray(b, np.float64)
        h = h @ w.T + b
        if i < len(params) - 1:
            h = np.maximum(h, 0.0)
    return h


if __name__ == "__main__":
    key = jax.random.PRNGKey(0)
    key, kx = jax.random.split(key)

    N = 1000  # deliberately not a tile multiple: exercises padding + multi-step grid
    x = jax.random.normal(kx, (N, 1), jnp.float32)
    params = init_params(key)

    out = deepnn_forward(x, params, tm=256)   # small demo tile -> 4 grid steps
    out = jax.block_until_ready(out)
    assert out.shape == (N, 1)

    # Tight check vs a JAX reference mirroring the kernel arithmetic
    # (same bf16 MXU operands, f32 accumulation): catches any wiring bug.
    ref_mimic = jax.block_until_ready(reference_forward_mimic(x, params))
    assert float(jnp.max(jnp.abs(out - ref_mimic))) < 5e-3, "mismatch vs mimic reference"

    # Gold-standard float64 reference: tolerance covers only the deliberate
    # bf16 rounding of MXU operands (structural bugs would be O(0.1-1)).
    ref64 = reference_forward_f64(np.asarray(x), params)
    assert float(np.max(np.abs(np.asarray(out, np.float64) - ref64))) < 3e-2, \
        "mismatch vs float64 reference"

    print("KERNEL_OK")
</pallas_src>

<mosaic_0001>
module attributes {stable_mosaic.version = 11 : i64} {
  func.func @deepnn_kernel(%arg0: i32, %arg1: memref<1x256xf32, #tpu.memory_space<vmem>>, %arg2: memref<128x1xf32, #tpu.memory_space<vmem>>, %arg3: memref<128x1xf32, #tpu.memory_space<vmem>>, %arg4: memref<128x128xbf16, #tpu.memory_space<vmem>>, %arg5: memref<128x1xf32, #tpu.memory_space<vmem>>, %arg6: memref<64x128xbf16, #tpu.memory_space<vmem>>, %arg7: memref<64x1xf32, #tpu.memory_space<vmem>>, %arg8: memref<64x64xbf16, #tpu.memory_space<vmem>>, %arg9: memref<64x1xf32, #tpu.memory_space<vmem>>, %arg10: memref<32x64xbf16, #tpu.memory_space<vmem>>, %arg11: memref<32x1xf32, #tpu.memory_space<vmem>>, %arg12: memref<32x1xf32, #tpu.memory_space<vmem>>, %arg13: memref<1x1xf32, #tpu.memory_space<vmem>>, %arg14: memref<1x256xf32, #tpu.memory_space<vmem>>) attributes {dimension_semantics = [#tpu.dimension_semantics<parallel>], iteration_bounds = array<i64: 4>, scalar_prefetch = 0 : i64, scratch_operands = 0 : i64, tpu.core_type = #tpu.core_type<tc>, window_params = [{transform_indices = @transform_0, window_bounds = array<i64: 1, 256>}, {pipeline_mode = #tpu.pipeline_mode<synchronous>, transform_indices = @transform_1, window_bounds = array<i64: 128, 1>}, {pipeline_mode = #tpu.pipeline_mode<synchronous>, transform_indices = @transform_2, window_bounds = array<i64: 128, 1>}, {pipeline_mode = #tpu.pipeline_mode<synchronous>, transform_indices = @transform_3, window_bounds = array<i64: 128, 128>}, {pipeline_mode = #tpu.pipeline_mode<synchronous>, transform_indices = @transform_4, window_bounds = array<i64: 128, 1>}, {pipeline_mode = #tpu.pipeline_mode<synchronous>, transform_indices = @transform_5, window_bounds = array<i64: 64, 128>}, {pipeline_mode = #tpu.pipeline_mode<synchronous>, transform_indices = @transform_6, window_bounds = array<i64: 64, 1>}, {pipeline_mode = #tpu.pipeline_mode<synchronous>, transform_indices = @transform_7, window_bounds = array<i64: 64, 64>}, {pipeline_mode = #tpu.pipeline_mode<synchronous>, transform_indices = @transform_8, window_bounds = array<i64: 64, 1>}, {pipeline_mode = #tpu.pipeline_mode<synchronous>, transform_indices = @transform_9, window_bounds = array<i64: 32, 64>}, {pipeline_mode = #tpu.pipeline_mode<synchronous>, transform_indices = @transform_10, window_bounds = array<i64: 32, 1>}, {pipeline_mode = #tpu.pipeline_mode<synchronous>, transform_indices = @transform_11, window_bounds = array<i64: 32, 1>}, {pipeline_mode = #tpu.pipeline_mode<synchronous>, transform_indices = @transform_12, window_bounds = array<i64: 1, 1>}, {transform_indices = @transform_13, window_bounds = array<i64: 1, 256>}]} {
    %c0 = arith.constant 0 : index
    %c0_0 = arith.constant 0 : index
    %0 = vector.load %arg1[%c0, %c0_0] : memref<1x256xf32, #tpu.memory_space<vmem>>, vector<1x256xf32>
    %c0_1 = arith.constant 0 : index
    %c0_2 = arith.constant 0 : index
    %1 = vector.load %arg2[%c0_1, %c0_2] : memref<128x1xf32, #tpu.memory_space<vmem>>, vector<128x1xf32>
    %2 = vector.broadcast %1 : vector<128x1xf32> to vector<128x256xf32>
    %3 = vector.broadcast %0 : vector<1x256xf32> to vector<128x256xf32>
    %4 = arith.mulf %2, %3 : vector<128x256xf32>
    %c0_3 = arith.constant 0 : index
    %c0_4 = arith.constant 0 : index
    %5 = vector.load %arg3[%c0_3, %c0_4] : memref<128x1xf32, #tpu.memory_space<vmem>>, vector<128x1xf32>
    %6 = vector.broadcast %5 : vector<128x1xf32> to vector<128x256xf32>
    %7 = arith.addf %4, %6 : vector<128x256xf32>
    %cst = arith.constant 0.000000e+00 : f32
    %8 = vector.broadcast %cst : f32 to vector<128x256xf32>
    %9 = arith.maximumf %7, %8 : vector<128x256xf32>
    %c0_5 = arith.constant 0 : index
    %c0_6 = arith.constant 0 : index
    %10 = vector.load %arg4[%c0_5, %c0_6] : memref<128x128xbf16, #tpu.memory_space<vmem>>, vector<128x128xbf16>
    %11 = arith.truncf %9 : vector<128x256xf32> to vector<128x256xbf16>
    %cst_7 = arith.constant dense<0.000000e+00> : vector<128x256xf32>
    %12 = tpu.matmul %10, %11, %cst_7 {dimension_numbers = #tpu.dot_dimension_numbers<[1], [0], [0], [1], [0, 0, 1, 1], [], []>} : vector<128x128xbf16>, vector<128x256xbf16>, vector<128x256xf32> -> vector<128x256xf32>
    %c0_8 = arith.constant 0 : index
    %c0_9 = arith.constant 0 : index
    %13 = vector.load %arg5[%c0_8, %c0_9] : memref<128x1xf32, #tpu.memory_space<vmem>>, vector<128x1xf32>
    %14 = vector.broadcast %13 : vector<128x1xf32> to vector<128x256xf32>
    %15 = arith.addf %12, %14 : vector<128x256xf32>
    %cst_10 = arith.constant 0.000000e+00 : f32
    %16 = vector.broadcast %cst_10 : f32 to vector<128x256xf32>
    %17 = arith.maximumf %15, %16 : vector<128x256xf32>
    %c0_11 = arith.constant 0 : index
    %c0_12 = arith.constant 0 : index
    %18 = vector.load %arg6[%c0_11, %c0_12] : memref<64x128xbf16, #tpu.memory_space<vmem>>, vector<64x128xbf16>
    %19 = arith.truncf %17 : vector<128x256xf32> to vector<128x256xbf16>
    %cst_13 = arith.constant dense<0.000000e+00> : vector<64x256xf32>
    %20 = tpu.matmul %18, %19, %cst_13 {dimension_numbers = #tpu.dot_dimension_numbers<[1], [0], [0], [1], [0, 0, 1, 1], [], []>} : vector<64x128xbf16>, vector<128x256xbf16>, vector<64x256xf32> -> vector<64x256xf32>
    %c0_14 = arith.constant 0 : index
    %c0_15 = arith.constant 0 : index
    %21 = vector.load %arg7[%c0_14, %c0_15] : memref<64x1xf32, #tpu.memory_space<vmem>>, vector<64x1xf32>
    %22 = vector.broadcast %21 : vector<64x1xf32> to vector<64x256xf32>
    %23 = arith.addf %20, %22 : vector<64x256xf32>
    %cst_16 = arith.constant 0.000000e+00 : f32
    %24 = vector.broadcast %cst_16 : f32 to vector<64x256xf32>
    %25 = arith.maximumf %23, %24 : vector<64x256xf32>
    %c0_17 = arith.constant 0 : index
    %c0_18 = arith.constant 0 : index
    %26 = vector.load %arg8[%c0_17, %c0_18] : memref<64x64xbf16, #tpu.memory_space<vmem>>, vector<64x64xbf16>
    %27 = arith.truncf %25 : vector<64x256xf32> to vector<64x256xbf16>
    %cst_19 = arith.constant dense<0.000000e+00> : vector<64x256xf32>
    %28 = tpu.matmul %26, %27, %cst_19 {dimension_numbers = #tpu.dot_dimension_numbers<[1], [0], [0], [1], [0, 0, 1, 1], [], []>} : vector<64x64xbf16>, vector<64x256xbf16>, vector<64x256xf32> -> vector<64x256xf32>
    %c0_20 = arith.constant 0 : index
    %c0_21 = arith.constant 0 : index
    %29 = vector.load %arg9[%c0_20, %c0_21] : memref<64x1xf32, #tpu.memory_space<vmem>>, vector<64x1xf32>
    %30 = vector.broadcast %29 : vector<64x1xf32> to vector<64x256xf32>
    %31 = arith.addf %28, %30 : vector<64x256xf32>
    %cst_22 = arith.constant 0.000000e+00 : f32
    %32 = vector.broadcast %cst_22 : f32 to vector<64x256xf32>
    %33 = arith.maximumf %31, %32 : vector<64x256xf32>
    %c0_23 = arith.constant 0 : index
    %c0_24 = arith.constant 0 : index
    %34 = vector.load %arg10[%c0_23, %c0_24] : memref<32x64xbf16, #tpu.memory_space<vmem>>, vector<32x64xbf16>
    %35 = arith.truncf %33 : vector<64x256xf32> to vector<64x256xbf16>
    %cst_25 = arith.constant dense<0.000000e+00> : vector<32x256xf32>
    %36 = tpu.matmul %34, %35, %cst_25 {dimension_numbers = #tpu.dot_dimension_numbers<[1], [0], [0], [1], [0, 0, 1, 1], [], []>} : vector<32x64xbf16>, vector<64x256xbf16>, vector<32x256xf32> -> vector<32x256xf32>
    %c0_26 = arith.constant 0 : index
    %c0_27 = arith.constant 0 : index
    %37 = vector.load %arg11[%c0_26, %c0_27] : memref<32x1xf32, #tpu.memory_space<vmem>>, vector<32x1xf32>
    %38 = vector.broadcast %37 : vector<32x1xf32> to vector<32x256xf32>
    %39 = arith.addf %36, %38 : vector<32x256xf32>
    %cst_28 = arith.constant 0.000000e+00 : f32
    %40 = vector.broadcast %cst_28 : f32 to vector<32x256xf32>
    %41 = arith.maximumf %39, %40 : vector<32x256xf32>
    %c0_29 = arith.constant 0 : index
    %c0_30 = arith.constant 0 : index
    %42 = vector.load %arg12[%c0_29, %c0_30] : memref<32x1xf32, #tpu.memory_space<vmem>>, vector<32x1xf32>
    %43 = vector.broadcast %42 : vector<32x1xf32> to vector<32x256xf32>
    %44 = arith.mulf %43, %41 : vector<32x256xf32>
    %cst_31 = arith.constant dense<0.000000e+00> : vector<256xf32>
    %45 = vector.multi_reduction <add>, %44, %cst_31 [0] : vector<32x256xf32> to vector<256xf32>
    %46 = vector.shape_cast %45 : vector<256xf32> to vector<1x256xf32>
    %c0_32 = arith.constant 0 : index
    %c0_33 = arith.constant 0 : index
    %47 = vector.load %arg13[%c0_32, %c0_33] : memref<1x1xf32, #tpu.memory_space<vmem>>, vector<1x1xf32>
    %48 = vector.broadcast %47 : vector<1x1xf32> to vector<1x256xf32>
    %49 = arith.addf %46, %48 : vector<1x256xf32>
    %c0_34 = arith.constant 0 : index
    %c0_35 = arith.constant 0 : index
    %50 = vector.load %arg14[%c0_34, %c0_35] : memref<1x256xf32, #tpu.memory_space<vmem>>, vector<1x256xf32>
    tpu.vector_store %arg14[%c0_34, %c0_35], %49 {strides = array<i32>} : memref<1x256xf32, #tpu.memory_space<vmem>>, vector<1x256xf32>,
    return
  }
  func.func @transform_0(%arg0: i32) -> (i32, i32) {
    %c0_i32 = arith.constant 0 : i32
    %c0_i32_0 = arith.constant 0 : i32
    return %c0_i32, %arg0 : i32, i32
  }
  func.func @transform_1(%arg0: i32) -> (i32, i32) {
    %c0_i32 = arith.constant 0 : i32
    %c0_i32_0 = arith.constant 0 : i32
    %c0_i32_1 = arith.constant 0 : i32
    return %c0_i32, %c0_i32_0 : i32, i32
  }
  func.func @transform_2(%arg0: i32) -> (i32, i32) {
    %c0_i32 = arith.constant 0 : i32
    %c0_i32_0 = arith.constant 0 : i32
    %c0_i32_1 = arith.constant 0 : i32
    return %c0_i32, %c0_i32_0 : i32, i32
  }
  func.func @transform_3(%arg0: i32) -> (i32, i32) {
    %c0_i32 = arith.constant 0 : i32
    %c0_i32_0 = arith.constant 0 : i32
    %c0_i32_1 = arith.constant 0 : i32
    return %c0_i32, %c0_i32_0 : i32, i32
  }
  func.func @transform_4(%arg0: i32) -> (i32, i32) {
    %c0_i32 = arith.constant 0 : i32
    %c0_i32_0 = arith.constant 0 : i32
    %c0_i32_1 = arith.constant 0 : i32
    return %c0_i32, %c0_i32_0 : i32, i32
  }
  func.func @transform_5(%arg0: i32) -> (i32, i32) {
    %c0_i32 = arith.constant 0 : i32
    %c0_i32_0 = arith.constant 0 : i32
    %c0_i32_1 = arith.constant 0 : i32
    return %c0_i32, %c0_i32_0 : i32, i32
  }
  func.func @transform_6(%arg0: i32) -> (i32, i32) {
    %c0_i32 = arith.constant 0 : i32
    %c0_i32_0 = arith.constant 0 : i32
    %c0_i32_1 = arith.constant 0 : i32
    return %c0_i32, %c0_i32_0 : i32, i32
  }
  func.func @transform_7(%arg0: i32) -> (i32, i32) {
    %c0_i32 = arith.constant 0 : i32
    %c0_i32_0 = arith.constant 0 : i32
    %c0_i32_1 = arith.constant 0 : i32
    return %c0_i32, %c0_i32_0 : i32, i32
  }
  func.func @transform_8(%arg0: i32) -> (i32, i32) {
    %c0_i32 = arith.constant 0 : i32
    %c0_i32_0 = arith.constant 0 : i32
    %c0_i32_1 = arith.constant 0 : i32
    return %c0_i32, %c0_i32_0 : i32, i32
  }
  func.func @transform_9(%arg0: i32) -> (i32, i32) {
    %c0_i32 = arith.constant 0 : i32
    %c0_i32_0 = arith.constant 0 : i32
    %c0_i32_1 = arith.constant 0 : i32
    return %c0_i32, %c0_i32_0 : i32, i32
  }
  func.func @transform_10(%arg0: i32) -> (i32, i32) {
    %c0_i32 = arith.constant 0 : i32
    %c0_i32_0 = arith.constant 0 : i32
    %c0_i32_1 = arith.constant 0 : i32
    return %c0_i32, %c0_i32_0 : i32, i32
  }
  func.func @transform_11(%arg0: i32) -> (i32, i32) {
    %c0_i32 = arith.constant 0 : i32
    %c0_i32_0 = arith.constant 0 : i32
    %c0_i32_1 = arith.constant 0 : i32
    return %c0_i32, %c0_i32_0 : i32, i32
  }
  func.func @transform_12(%arg0: i32) -> (i32, i32) {
    %c0_i32 = arith.constant 0 : i32
    %c0_i32_0 = arith.constant 0 : i32
    %c0_i32_1 = arith.constant 0 : i32
    return %c0_i32, %c0_i32_0 : i32, i32
  }
  func.func @transform_13(%arg0: i32) -> (i32, i32) {
    %c0_i32 = arith.constant 0 : i32
    %c0_i32_0 = arith.constant 0 : i32
    return %c0_i32, %arg0 : i32, i32
  }
}

</mosaic_0001>

<bundles_post_ra>
// kernel: deepnn_forward.1
= control target key start
LH: loop header
LB: loop body
LE: loop exit
PB: predicated region body
PF: predicated region fallthrough
CT: control target
= control target key end

     0   :  { %s1833_s27 = smov 0   ;;  %s2199_s0 = inlined_call_operand.vmem [shape: f32[1,1024], index: 0, kind: input, shape index: {}]   ;;  %s2200_s1 = inlined_call_operand.vmem [shape: f32[128,1], index: 1, kind: input, shape index: {}]   ;;  %s2201_s2 = inlined_call_operand.vmem [shape: f32[128,1], index: 2, kind: input, shape index: {}]   ;;  %s2202_s3 = inlined_call_operand.vmem [shape: bf16[128,128], index: 3, kind: input, shape index: {}]   ;;  %s2203_s4 = inlined_call_operand.vmem [shape: f32[128,1], index: 4, kind: input, shape index: {}]   ;;  %s2204_s5 = inlined_call_operand.vmem [shape: bf16[64,128], index: 5, kind: input, shape index: {}]   ;;  %s2205_s6 = inlined_call_operand.vmem [shape: f32[64,1], index: 6, kind: input, shape index: {}]   ;;  %s2206_s7 = inlined_call_operand.vmem [shape: bf16[64,64], index: 7, kind: input, shape index: {}]   ;;  %s2207_s8 = inlined_call_operand.vmem [shape: f32[64,1], index: 8, kind: input, shape index: {}]   ;;  %s2208_s9 = inlined_call_operand.vmem [shape: bf16[32,64], index: 9, kind: input, shape index: {}]   ;;  %s2209_s10 = inlined_call_operand.vmem [shape: f32[32,1], index: 10, kind: input, shape index: {}]   ;;  %s2210_s11 = inlined_call_operand.vmem [shape: f32[32,1], index: 11, kind: input, shape index: {}]   ;;  %s2211_s12 = inlined_call_operand.<no memory space> [shape: f32[1,1], index: 12, kind: input, shape index: {}]   ;;  %s2212_s13 = inlined_call_operand.vmem [shape: f32[1,1024], index: 13, kind: output, shape index: {}]  }
   0x1   :  { %v18_v0 = vstv %s2211_s12 }
   0x2   :  { %19 = vst [vmem:[#allocation2] sm:$0x1] %v18_v0 }
   0x3 LB: > { %s1679_s28 = sadd.s32 4294967295, %s1756_s27   ;;  %p1683_p0 = scmp.ge.s32.totalorder %s1756_s27, 1  ;;  %s1756_s27 = sphi %s1833_s27, %s25_s27  }
   0x4   : > { %p389_p1 = scmp.lt.s32.totalorder %s1756_s27, 5 }
   0x6   : > { %p390_p2 = pnand %p1683_p0, %p389_p1 }
   0x7   : > { %v582_v1 = vld [vmem:[%s2201_s2] sm:$0xff] (!%p390_p2)  ;;  %v1758_v3 = vmov (!%p390_p2), 0   ;;  %v583_v4 = vld [vmem:[%s2201_s2 + $0x8] sm:$0xff] (!%p390_p2)  ;;  %v446_v6 = vld [vmem:[%s2200_s1 + $0x18] sm:$0xff] (!%p390_p2)  ;;  %s1684_s29 = sshll.u32 (!%p390_p2), %s1679_s28, 1  ;;  %v540_v62 = vlaneseq (!%p390_p2)  ;;  %vm1332_vm0 = vcmask (!%p390_p2), 523264  }
   0x8   : > { %393 = sbr.rel (%p390_p2) target bundleno = 1234 (0x4d2), region = 72  ;;  %v443_v2 = vld [vmem:[%s2200_s1] sm:$0xff] (!%p390_p2)  ;;  %1731 = vset.pattern.permute.xlu1 (!%p390_p2), %v1758_v3  ;;  %1730 = vset.pattern.permute.xlu0 (!%p390_p2), %v1758_v3  ;;  %v444_v5 = vld [vmem:[%s2200_s1 + $0x8] sm:$0xff] (!%p390_p2)  ;;  %v445_v7 = vld [vmem:[%s2200_s1 + $0x10] sm:$0xff] (!%p390_p2)  ;;  %p432_p3 = scmp.lt.s32.totalorder (!%p390_p2), %s1684_s29, 7 }
   0x9   : > { %600 = vperm.xlu1 (!%p390_p2), %1731, %v582_v1   ;;  %461 = vperm.xlu0 (!%p390_p2), %1730, %v443_v2   ;;  %v585_v8 = vld [vmem:[%s2201_s2 + $0x18] sm:$0xff] (!%p390_p2)  ;;  %v584_v9 = vld [vmem:[%s2201_s2 + $0x10] sm:$0xff] (!%p390_p2)  ;;  %v448_v10 = vld [vmem:[%s2200_s1 + $0x28] sm:$0xff] (!%p390_p2)  ;;  %v2036_v1 = vshrl.u32 (!%p390_p2), %v540_v62, 7  ;;  %vm1629_vm1 = vcmp.lt.s32.totalorder (!%p390_p2), %v540_v62, 256 }
   0xa   : > { %950 = vmatprep.mubr.bf16.mxu0 (!%p390_p2), %v1758_v3  ;;  %1191 = vmatprep.mubr.bf16.mxu1 (!%p390_p2), %v1758_v3  ;;  %v447_v11 = vld [vmem:[%s2200_s1 + $0x20] sm:$0xff] (!%p390_p2)  ;;  %v587_v12 = vld [vmem:[%s2201_s2 + $0x28] sm:$0xff] (!%p390_p2)  ;;  %v450_v14 = vld [vmem:[%s2200_s1 + $0x38] sm:$0xff] (!%p390_p2) }
   0xb   : > { %v586_v13 = vld [vmem:[%s2201_s2 + $0x20] sm:$0xff] (!%p390_p2)  ;;  %v449_v15 = vld [vmem:[%s2200_s1 + $0x30] sm:$0xff] (!%p390_p2)  ;;  %v589_v16 = vld [vmem:[%s2201_s2 + $0x38] sm:$0xff] (!%p390_p2) }
   0xc   : > { %v588_v17 = vld [vmem:[%s2201_s2 + $0x30] sm:$0xff] (!%p390_p2)  ;;  %v452_v18 = vld [vmem:[%s2200_s1 + $0x48] sm:$0xff] (!%p390_p2)  ;;  %v451_v19 = vld [vmem:[%s2200_s1 + $0x40] sm:$0xff] (!%p390_p2) }
   0xd   : > { %605 = vperm.xlu1 (!%p390_p2), %1731, %v583_v4   ;;  %466 = vperm.xlu0 (!%p390_p2), %1730, %v444_v5   ;;  %v591_v20 = vld [vmem:[%s2201_s2 + $0x48] sm:$0xff] (!%p390_p2)  ;;  %v590_v21 = vld [vmem:[%s2201_s2 + $0x40] sm:$0xff] (!%p390_p2)  ;;  %v454_v22 = vld [vmem:[%s2200_s1 + $0x58] sm:$0xff] (!%p390_p2)  ;;  %v542_v5 = vsub.s32 (!%p390_p2), 0, %v2036_v1 }
   0xe   : > { %v453_v23 = vld [vmem:[%s2200_s1 + $0x50] sm:$0xff] (!%p390_p2)  ;;  %v593_v24 = vld [vmem:[%s2201_s2 + $0x58] sm:$0xff] (!%p390_p2)  ;;  %v456_v26 = vld [vmem:[%s2200_s1 + $0x68] sm:$0xff] (!%p390_p2) }
   0xf   : > { %v592_v25 = vld [vmem:[%s2201_s2 + $0x50] sm:$0xff]  ;;  %v455_v27 = vld [vmem:[%s2200_s1 + $0x60] sm:$0xff]  ;;  %v595_v28 = vld [vmem:[%s2201_s2 + $0x68] sm:$0xff]  ;;  %s2214_s29 = smov (!%p432_p3, %s1684_s29), 7 }
  0x10   : > { %v594_v29 = vld [vmem:[%s2201_s2 + $0x60] sm:$0xff]  ;;  %v458_v30 = vld [vmem:[%s2200_s1 + $0x78] sm:$0xff]  ;;  %v457_v31 = vld [vmem:[%s2200_s1 + $0x70] sm:$0xff]  ;;  %s434_s25 = scalar_lea.vmem %s2199_s0, %s2214_s29  ;;  %s439_s20 = scalar_lea.vmem %s2212_s13, %s2214_s29 }
  0x11   : > { %476 = vperm.xlu1 %1731, %v446_v6   ;;  %471 = vperm.xlu0 %1730, %v445_v7   ;;  %v597_v32 = vld [vmem:[%s2201_s2 + $0x78] sm:$0xff]  ;;  %v596_v33 = vld [vmem:[%s2201_s2 + $0x70] sm:$0xff]  ;;  %v775_v34 = vld [vmem:[%s2203_s4 + $0x8] sm:$0xff]  ;;  %v546_v6 = vsub.s32 1, %v2036_v1 }
  0x12   : > { %v774_v35 = vld [vmem:[%s2203_s4] sm:$0xff]  ;;  %v777_v36 = vld [vmem:[%s2203_s4 + $0x18] sm:$0xff]  ;;  %v776_v37 = vld [vmem:[%s2203_s4 + $0x10] sm:$0xff] }
  0x13   : > { %v779_v38 = vld [vmem:[%s2203_s4 + $0x28] sm:$0xff]  ;;  %v778_v39 = vld [vmem:[%s2203_s4 + $0x20] sm:$0xff]  ;;  %v781_v40 = vld [vmem:[%s2203_s4 + $0x38] sm:$0xff] }
  0x14   : > { %v780_v41 = vld [vmem:[%s2203_s4 + $0x30] sm:$0xff]  ;;  %v783_v42 = vld [vmem:[%s2203_s4 + $0x48] sm:$0xff]  ;;  %v782_v43 = vld [vmem:[%s2203_s4 + $0x40] sm:$0xff] }
  0x15   : > { %615 = vperm.xlu1 %1731, %v585_v8   ;;  %610 = vperm.xlu0 %1730, %v584_v9   ;;  %v785_v44 = vld [vmem:[%s2203_s4 + $0x58] sm:$0xff]  ;;  %v784_v45 = vld [vmem:[%s2203_s4 + $0x50] sm:$0xff]  ;;  %v787_v46 = vld [vmem:[%s2203_s4 + $0x68] sm:$0xff] }
  0x16   : > { %v786_v47 = vld [vmem:[%s2203_s4 + $0x60] sm:$0xff]  ;;  %v789_v48 = vld [vmem:[%s2203_s4 + $0x78] sm:$0xff]  ;;  %v788_v49 = vld [vmem:[%s2203_s4 + $0x70] sm:$0xff] }
  0x17   : > { %v1088_v50 = vld [vmem:[%s2205_s6 + $0x8] sm:$0xff]  ;;  %v1087_v51 = vld [vmem:[%s2205_s6] sm:$0xff]  ;;  %v1090_v52 = vld [vmem:[%s2205_s6 + $0x18] sm:$0xff] }
  0x18   : > { %v1089_v53 = vld [vmem:[%s2205_s6 + $0x10] sm:$0xff]  ;;  %v1092_v54 = vld [vmem:[%s2205_s6 + $0x28] sm:$0xff]  ;;  %v1091_v55 = vld [vmem:[%s2205_s6 + $0x20] sm:$0xff] }
  0x19   : > { %486 = vperm.xlu1 %1731, %v448_v10   ;;  %481 = vperm.xlu0 %1730, %v447_v11   ;;  %v1094_v56 = vld [vmem:[%s2205_s6 + $0x38] sm:$0xff]  ;;  %v1093_v57 = vld [vmem:[%s2205_s6 + $0x30] sm:$0xff]  ;;  %v1265_v58 = vld [vmem:[%s2207_s8 + $0x8] sm:$0xff] }
  0x1a   : > { %v1264_v59 = vld [vmem:[%s2207_s8] sm:$0xff]  ;;  %v1267_v60 = vld [vmem:[%s2207_s8 + $0x18] sm:$0xff]  ;;  %v1266_v61 = vld [vmem:[%s2207_s8 + $0x10] sm:$0xff] }
  0x1b   : > { %v1269_v63 = vld [vmem:[%s2207_s8 + $0x28] sm:$0xff]  ;;  %v1268_v0 = vld [vmem:[%s2207_s8 + $0x20] sm:$0xff]  ;;  %v1271_v2 = vld [vmem:[%s2207_s8 + $0x38] sm:$0xff] }
  0x1c   : > { %v1270_v4 = vld [vmem:[%s2207_s8 + $0x30] sm:$0xff]  ;;  %v442_v7 = vld [vmem:[%s434_s25] sm:$0x3]  ;;  %v1447_v10 = vld [vmem:[%s2209_s10 + $0x8] sm:$0xff] }
  0x1d   : > { %625 = vperm.xlu1 %1731, %v587_v12   ;;  %620 = vperm.xlu0 %1730, %v586_v13   ;;  %v2052_v8 = vrot.slane %v442_v7, %v542_v5  ;;  %v2054_v9 = vrot.slane %v442_v7, %v546_v6  ;;  %v1446_v11 = vld [vmem:[%s2209_s10] sm:$0xff] }
  0x21   : > { %496 = vperm.xlu1 %1731, %v450_v14   ;;  %491 = vperm.xlu0 %1730, %v449_v15  }
  0x25   : > { %635 = vperm.xlu1 %1731, %v589_v16   ;;  %630 = vperm.xlu0 %1730, %v588_v17   ;;  %v1449_v16 = vld [vmem:[%s2209_s10 + $0x18] sm:$0xff]  ;;  %v1448_v17 = vld [vmem:[%s2209_s10 + $0x10] sm:$0xff] }
  0x29   : > { %506 = vperm.xlu1 %1731, %v452_v18   ;;  %501 = vperm.xlu0 %1730, %v451_v19  }
  0x2d   : > { %645 = vperm.xlu1 %1731, %v591_v20   ;;  %640 = vperm.xlu0 %1730, %v590_v21  }
  0x31   : > { %516 = vperm.xlu1 %1731, %v454_v22   ;;  %511 = vperm.xlu0 %1730, %v453_v23   ;;  %v1548_v23 = vld [vmem:[%s2210_s11 + $0x8] sm:$0xff] }
  0x35   : > { %655 = vperm.xlu1 %1731, %v593_v24   ;;  %650 = vperm.xlu0 %1730, %v592_v25  }
  0x39   : > { %526 = vperm.xlu1 %1731, %v456_v26   ;;  %521 = vperm.xlu0 %1730, %v455_v27   ;;  %v1547_v26 = vld [vmem:[%s2210_s11] sm:$0xff] }
  0x3d   : > { %665 = vperm.xlu1 %1731, %v595_v28   ;;  %660 = vperm.xlu0 %1730, %v594_v29  }
  0x41   : > { %536 = vperm.xlu1 %1731, %v458_v30   ;;  %531 = vperm.xlu0 %1730, %v457_v31   ;;  %v1550_v30 = vld [vmem:[%s2210_s11 + $0x18] sm:$0xff] }
  0x45   : > { %675 = vperm.xlu1 %1731, %v597_v32   ;;  %670 = vperm.xlu0 %1730, %v596_v33  }
  0x49   : > { %797 = vperm.xlu1 %1731, %v775_v34   ;;  %792 = vperm.xlu0 %1730, %v774_v35  }
  0x4d   : > { %807 = vperm.xlu1 %1731, %v777_v36   ;;  %802 = vperm.xlu0 %1730, %v776_v37  }
  0x51   : > { %817 = vperm.xlu1 %1731, %v779_v38   ;;  %812 = vperm.xlu0 %1730, %v778_v39   ;;  %v1549_v39 = vld [vmem:[%s2210_s11 + $0x10] sm:$0xff] }
  0x55   : > { %827 = vperm.xlu1 %1731, %v781_v40   ;;  %822 = vperm.xlu0 %1730, %v780_v41  }
  0x59   : > { %837 = vperm.xlu1 %1731, %v783_v42   ;;  %832 = vperm.xlu0 %1730, %v782_v43  }
  0x5d   : > { %847 = vperm.xlu1 %1731, %v785_v44   ;;  %842 = vperm.xlu0 %1730, %v784_v45  }
  0x61   : > { %857 = vperm.xlu1 %1731, %v787_v46   ;;  %852 = vperm.xlu0 %1730, %v786_v47  }
  0x65   : > { %867 = vperm.xlu1 %1731, %v789_v48   ;;  %862 = vperm.xlu0 %1730, %v788_v49  }
  0x69   : > { %1102 = vperm.xlu1 %1731, %v1088_v50   ;;  %1097 = vperm.xlu0 %1730, %v1087_v51  }
  0x6d   : > { %1112 = vperm.xlu1 %1731, %v1090_v52   ;;  %1107 = vperm.xlu0 %1730, %v1089_v53   ;;  %v1597_v52 = vld [vmem:[#allocation2] sm:$0x1] }
  0x71   : > { %1122 = vperm.xlu1 %1731, %v1092_v54   ;;  %1117 = vperm.xlu0 %1730, %v1091_v55  }
  0x75   : > { %1132 = vperm.xlu1 %1731, %v1094_v56   ;;  %1127 = vperm.xlu0 %1730, %v1093_v57  }
  0x79   : > { %1279 = vperm.xlu1 %1731, %v1265_v58   ;;  %1274 = vperm.xlu0 %1730, %v1264_v59  }
  0x7d   : > { %1289 = vperm.xlu1 %1731, %v1267_v60   ;;  %1284 = vperm.xlu0 %1730, %v1266_v61  }
  0x81   : > { %1299 = vperm.xlu1 %1731, %v1269_v63   ;;  %1294 = vperm.xlu0 %1730, %v1268_v0  }
  0x85   : > { %1309 = vperm.xlu1 %1731, %v1271_v2   ;;  %1304 = vperm.xlu0 %1730, %v1270_v4  }
  0x88   : > { %v601_v12 = vpop.permute.xlu1 %600  ;;  %v462_v13 = vpop.permute.xlu0 %461 }
  0x89   : > { %1457 = vperm.xlu1 %1731, %v1447_v10   ;;  %1452 = vperm.xlu0 %1730, %v1446_v11   ;;  %v550_v14 = vmul.f32 %v2052_v8, %v462_v13  ;;  %v551_v15 = vmul.f32 %v2054_v9, %v462_v13 }
  0x8b   : > { %v678_v22 = vadd.f32 %v601_v12, %v550_v14  ;;  %v679_v24 = vadd.f32 %v601_v12, %v551_v15 }
  0x8c   : > { %v606_v18 = vpop.permute.xlu1 %605  ;;  %v467_v19 = vpop.permute.xlu0 %466 }
  0x8d   : > { %v552_v20 = vmul.f32 %v2052_v8, %v467_v19  ;;  %v553_v21 = vmul.f32 %v2054_v9, %v467_v19  ;;  %1467 = vperm.xlu1 %1731, %v1449_v16   ;;  %1462 = vperm.xlu0 %1730, %v1448_v17   ;;  %v711_v31 = vmax.f32 %v679_v24, 0.0  ;;  %v710_v33 = vmax.f32 %v678_v22, 0.0 }
  0x8f   : > { %v680_v25 = vadd.f32 %v606_v18, %v552_v20  ;;  %v681_v27 = vadd.f32 %v606_v18, %v553_v21 }
  0x90   : > { %v477_v28 = vpop.permute.xlu1 %476  ;;  %v472_v29 = vpop.permute.xlu0 %471 }
  0x91   : > { %1558 = vperm.xlu1 %1731, %v1548_v23   ;;  %1553 = vperm.xlu0 %1730, %v1547_v26   ;;  %v713_v32 = vmax.f32 %v681_v27, 0.0  ;;  %v712_v34 = vmax.f32 %v680_v25, 0.0  ;;  %v556_v35 = vmul.f32 %v2052_v8, %v477_v28  ;;  %v557_v36 = vmul.f32 %v2054_v9, %v477_v28 }
  0x92   : > { %v554_v37 = vmul.f32 %v2052_v8, %v472_v29  ;;  %v555_v38 = vmul.f32 %v2054_v9, %v472_v29 }
  0x93   : > { %v759_v42 = vpack.c.bf16 %v713_v32, %v711_v31  ;;  %v758_v43 = vpack.c.bf16 %v712_v34, %v710_v33 }
  0x94   : > { %v616_v40 = vpop.permute.xlu1 %615  ;;  %v611_v41 = vpop.permute.xlu0 %610 }
  0x95   : > { %v684_v44 = vadd.f32 %v616_v40, %v556_v35  ;;  %v685_v45 = vadd.f32 %v616_v40, %v557_v36  ;;  %v682_v46 = vadd.f32 %v611_v41, %v554_v37  ;;  %v683_v47 = vadd.f32 %v611_v41, %v555_v38  ;;  %1568 = vperm.xlu1 %1731, %v1550_v30  }
  0x96   : > { %1563 = vperm.xlu0 %1730, %v1549_v39   ;;  %918 = vmatprep.subr.bf16.mxu0 %v759_v42 }
  0x97   : > { %v716_v48 = vmax.f32 %v684_v44, 0.0  ;;  %v717_v49 = vmax.f32 %v685_v45, 0.0  ;;  %v714_v50 = vmax.f32 %v682_v46, 0.0  ;;  %v715_v51 = vmax.f32 %v683_v47, 0.0  ;;  %919 = vmatpush1.bf16.msra.mxu0 %v758_v43 }
  0x98   : > { %v487_v53 = vpop.permute.xlu1 %486  ;;  %v482_v54 = vpop.permute.xlu0 %481 }
  0x99   : > { %v761_v55 = vpack.c.bf16 %v717_v49, %v715_v51  ;;  %v760_v56 = vpack.c.bf16 %v716_v48, %v714_v50  ;;  %v560_v57 = vmul.f32 %v2052_v8, %v487_v53  ;;  %v561_v58 = vmul.f32 %v2054_v9, %v487_v53 }
  0x9a   : > { %1600 = vperm.xlu0 %1730, %v1597_v52   ;;  %v558_v59 = vmul.f32 %v2052_v8, %v482_v54  ;;  %v559_v60 = vmul.f32 %v2054_v9, %v482_v54 }
  0x9b   : > { %920 = vmatprep.subr.bf16.mxu0 %v761_v55 }
  0x9c   : > { %v626_v61 = vpop.permute.xlu1 %625  ;;  %v621_v63 = vpop.permute.xlu0 %620  ;;  %921 = vmatpush1.bf16.msra.mxu0 %v760_v56 }
  0x9d   : > { %v688_v0 = vadd.f32 %v626_v61, %v560_v57  ;;  %v689_v2 = vadd.f32 %v626_v61, %v561_v58  ;;  %v686_v4 = vadd.f32 %v621_v63, %v558_v59  ;;  %v687_v6 = vadd.f32 %v621_v63, %v559_v60 }
  0x9f   : > { %v720_v7 = vmax.f32 %v688_v0, 0.0  ;;  %v721_v10 = vmax.f32 %v689_v2, 0.0  ;;  %v718_v11 = vmax.f32 %v686_v4, 0.0  ;;  %v719_v12 = vmax.f32 %v687_v6, 0.0 }
  0xa0   : > { %v497_v13 = vpop.permute.xlu1 %496  ;;  %v492_v14 = vpop.permute.xlu0 %491 }
  0xa1   : > { %v763_v15 = vpack.c.bf16 %v721_v10, %v719_v12  ;;  %v762_v16 = vpack.c.bf16 %v720_v7, %v718_v11  ;;  %v564_v17 = vmul.f32 %v2052_v8, %v497_v13  ;;  %v565_v18 = vmul.f32 %v2054_v9, %v497_v13 }
  0xa2   : > { %v562_v19 = vmul.f32 %v2052_v8, %v492_v14  ;;  %v563_v20 = vmul.f32 %v2054_v9, %v492_v14 }
  0xa3   : > { %922 = vmatprep.subr.bf16.mxu0 %v763_v15 }
  0xa4   : > { %v636_v21 = vpop.permute.xlu1 %635  ;;  %v631_v22 = vpop.permute.xlu0 %630  ;;  %923 = vmatpush1.bf16.msra.mxu0 %v762_v16 }
  0xa5   : > { %v692_v23 = vadd.f32 %v636_v21, %v564_v17  ;;  %v693_v24 = vadd.f32 %v636_v21, %v565_v18  ;;  %v690_v25 = vadd.f32 %v631_v22, %v562_v19  ;;  %v691_v26 = vadd.f32 %v631_v22, %v563_v20 }
  0xa7   : > { %v724_v27 = vmax.f32 %v692_v23, 0.0  ;;  %v725_v28 = vmax.f32 %v693_v24, 0.0  ;;  %v722_v29 = vmax.f32 %v690_v25, 0.0  ;;  %v723_v30 = vmax.f32 %v691_v26, 0.0 }
  0xa8   : > { %v507_v31 = vpop.permute.xlu1 %506  ;;  %v502_v32 = vpop.permute.xlu0 %501 }
  0xa9   : > { %v765_v33 = vpack.c.bf16 %v725_v28, %v723_v30  ;;  %v764_v34 = vpack.c.bf16 %v724_v27, %v722_v29  ;;  %v568_v35 = vmul.f32 %v2052_v8, %v507_v31  ;;  %v569_v36 = vmul.f32 %v2054_v9, %v507_v31 }
  0xaa   : > { %v566_v37 = vmul.f32 %v2052_v8, %v502_v32  ;;  %v567_v38 = vmul.f32 %v2054_v9, %v502_v32 }
  0xab   : > { %924 = vmatprep.subr.bf16.mxu0 %v765_v33 }
  0xac   : > { %v646_v39 = vpop.permute.xlu1 %645  ;;  %v641_v40 = vpop.permute.xlu0 %640  ;;  %925 = vmatpush1.bf16.msra.mxu0 %v764_v34 }
  0xad   : > { %v696_v41 = vadd.f32 %v646_v39, %v568_v35  ;;  %v697_v42 = vadd.f32 %v646_v39, %v569_v36  ;;  %v694_v43 = vadd.f32 %v641_v40, %v566_v37  ;;  %v695_v44 = vadd.f32 %v641_v40, %v567_v38 }
  0xaf   : > { %v728_v45 = vmax.f32 %v696_v41, 0.0  ;;  %v729_v46 = vmax.f32 %v697_v42, 0.0  ;;  %v726_v47 = vmax.f32 %v694_v43, 0.0  ;;  %v727_v48 = vmax.f32 %v695_v44, 0.0 }
  0xb0   : > { %v517_v49 = vpop.permute.xlu1 %516  ;;  %v512_v50 = vpop.permute.xlu0 %511 }
  0xb1   : > { %v767_v51 = vpack.c.bf16 %v729_v46, %v727_v48  ;;  %v766_v52 = vpack.c.bf16 %v728_v45, %v726_v47  ;;  %v572_v53 = vmul.f32 %v2052_v8, %v517_v49  ;;  %v573_v54 = vmul.f32 %v2054_v9, %v517_v49  ;;  %v1734_v47 = vld [vmem:[%s2202_s3 + $0x10] sm:$0xff]   ;;  %v1735_v48 = vld [vmem:[%s2202_s3 + $0x18] sm:$0xff]   ;;  %v1736_v49 = vld [vmem:[%s2202_s3 + $0x20] sm:$0xff]  }
  0xb2   : > { %v570_v55 = vmul.f32 %v2052_v8, %v512_v50  ;;  %v571_v56 = vmul.f32 %v2054_v9, %v512_v50  ;;  %v1737_v50 = vld [vmem:[%s2202_s3 + $0x28] sm:$0xff]  }
  0xb3   : > { %926 = vmatprep.subr.bf16.mxu0 %v767_v51  ;;  %v1738_v51 = vld [vmem:[%s2202_s3 + $0x30] sm:$0xff]  }
  0xb4   : > { %v656_v57 = vpop.permute.xlu1 %655  ;;  %v651_v58 = vpop.permute.xlu0 %650  ;;  %927 = vmatpush1.bf16.msra.mxu0 %v766_v52  ;;  %v1739_v52 = vld [vmem:[%s2202_s3 + $0x38] sm:$0xff]  }
  0xb5   : > { %v700_v59 = vadd.f32 %v656_v57, %v572_v53  ;;  %v701_v60 = vadd.f32 %v656_v57, %v573_v54  ;;  %v698_v61 = vadd.f32 %v651_v58, %v570_v55  ;;  %v699_v63 = vadd.f32 %v651_v58, %v571_v56 }
  0xb7   : > { %v732_v0 = vmax.f32 %v700_v59, 0.0  ;;  %v733_v2 = vmax.f32 %v701_v60, 0.0  ;;  %v730_v4 = vmax.f32 %v698_v61, 0.0  ;;  %v731_v6 = vmax.f32 %v699_v63, 0.0 }
  0xb8   : > { %v527_v7 = vpop.permute.xlu1 %526  ;;  %v522_v10 = vpop.permute.xlu0 %521 }
  0xb9   : > { %v769_v11 = vpack.c.bf16 %v733_v2, %v731_v6  ;;  %v768_v12 = vpack.c.bf16 %v732_v0, %v730_v4  ;;  %v576_v13 = vmul.f32 %v2052_v8, %v527_v7  ;;  %v577_v14 = vmul.f32 %v2054_v9, %v527_v7 }
  0xba   : > { %v574_v15 = vmul.f32 %v2052_v8, %v522_v10  ;;  %v575_v16 = vmul.f32 %v2054_v9, %v522_v10 }
  0xbb   : > { %928 = vmatprep.subr.bf16.mxu0 %v769_v11 }
  0xbc   : > { %v666_v17 = vpop.permute.xlu1 %665  ;;  %v661_v18 = vpop.permute.xlu0 %660  ;;  %929 = vmatpush1.bf16.msra.mxu0 %v768_v12 }
  0xbd   : > { %v704_v19 = vadd.f32 %v666_v17, %v576_v13  ;;  %v705_v20 = vadd.f32 %v666_v17, %v577_v14  ;;  %v702_v21 = vadd.f32 %v661_v18, %v574_v15  ;;  %v703_v22 = vadd.f32 %v661_v18, %v575_v16 }
  0xbf   : > { %v736_v23 = vmax.f32 %v704_v19, 0.0  ;;  %v737_v24 = vmax.f32 %v705_v20, 0.0  ;;  %v734_v25 = vmax.f32 %v702_v21, 0.0  ;;  %v735_v26 = vmax.f32 %v703_v22, 0.0 }
  0xc0   : > { %v537_v27 = vpop.permute.xlu1 %536  ;;  %v532_v28 = vpop.permute.xlu0 %531 }
  0xc1   : > { %v771_v29 = vpack.c.bf16 %v737_v24, %v735_v26  ;;  %v770_v30 = vpack.c.bf16 %v736_v23, %v734_v25  ;;  %v580_v31 = vmul.f32 %v2052_v8, %v537_v27  ;;  %v581_v32 = vmul.f32 %v2054_v9, %v537_v27 }
  0xc2   : > { %v578_v33 = vmul.f32 %v2052_v8, %v532_v28  ;;  %v579_v34 = vmul.f32 %v2054_v9, %v532_v28  ;;  %v1732_v8 = vld [vmem:[%s2202_s3] sm:$0xff]   ;;  %v1733_v9 = vld [vmem:[%s2202_s3 + $0x8] sm:$0xff]  }
  0xc3   : > { %930 = vmatprep.subr.bf16.mxu0 %v771_v29 }
  0xc4   : > { %v676_v35 = vpop.permute.xlu1 %675  ;;  %v671_v36 = vpop.permute.xlu0 %670  ;;  %931 = vmatpush1.bf16.msra.mxu0 %v770_v30 }
  0xc5   : > { %v708_v37 = vadd.f32 %v676_v35, %v580_v31  ;;  %v709_v38 = vadd.f32 %v676_v35, %v581_v32  ;;  %v706_v39 = vadd.f32 %v671_v36, %v578_v33  ;;  %v707_v40 = vadd.f32 %v671_v36, %v579_v34 }
  0xc7   : > { %v740_v41 = vmax.f32 %v708_v37, 0.0  ;;  %v741_v42 = vmax.f32 %v709_v38, 0.0  ;;  %v738_v43 = vmax.f32 %v706_v39, 0.0  ;;  %v739_v44 = vmax.f32 %v707_v40, 0.0 }
  0xc8   : > { %v793_v53 = vpop.permute.xlu0 %792  ;;  %v798_v57 = vpop.permute.xlu1 %797 }
  0xc9   : > { %v773_v45 = vpack.c.bf16 %v741_v42, %v739_v44  ;;  %v772_v46 = vpack.c.bf16 %v740_v41, %v738_v43 }
  0xcb   : > { %932 = vmatprep.subr.bf16.mxu0 %v773_v45 }
  0xcc   : > { %933 = vmatpush1.bf16.msra.mxu0 %v772_v46  ;;  %v803_v10 = vpop.permute.xlu0 %802  ;;  %v808_v15 = vpop.permute.xlu1 %807 }
  0xcf   : > { %951 = vmatmul.mubr.bf16.vlgmr.msra.gmra.mrb[0].mxu0 %v1732_v8 }
  0xd0   : > { %960 = vmatprep.mubr.bf16.mxu0 %v1758_v3  ;;  %v813_v26 = vpop.permute.xlu0 %812  ;;  %v818_v31 = vpop.permute.xlu1 %817 }
  0xd4   : > { %v823_v42 = vpop.permute.xlu0 %822  ;;  %v828_v8 = vpop.permute.xlu1 %827 }
  0xd7   : > { %961 = vmatmul.mubr.bf16.gmra.mrb[4].mxu0 %v1733_v9 }
  0xd8   : > { %970 = vmatprep.mubr.bf16.mxu0 %v1758_v3 }
  0xdf   : > { %971 = vmatmul.mubr.bf16.gmra.mrb[8].mxu0 %v1734_v47 }
  0xe0   : > { %980 = vmatprep.mubr.bf16.mxu0 %v1758_v3 }
  0xe7   : > { %981 = vmatmul.mubr.bf16.gmra.mrb[12].mxu0 %v1735_v48 }
  0xe8   : > { %990 = vmatprep.mubr.bf16.mxu0 %v1758_v3 }
  0xef   : > { %991 = vmatmul.mubr.bf16.gmra.mrb[16].mxu0 %v1736_v49 }
  0xf0   : > { %1000 = vmatprep.mubr.bf16.mxu0 %v1758_v3 }
  0xf7   : > { %1001 = vmatmul.mubr.bf16.gmra.mrb[20].mxu0 %v1737_v50 }
  0xf8   : > { %1010 = vmatprep.mubr.bf16.mxu0 %v1758_v3 }
  0xff   : > { %1011 = vmatmul.mubr.bf16.gmra.mrb[24].mxu0 %v1738_v51 }
 0x100   : > { %1020 = vmatprep.mubr.bf16.mxu0 %v1758_v3 }
 0x107   : > { %1021 = vmatmul.mubr.bf16.gmra.mrb[28].mxu0 %v1739_v52 }
 0x108   : > { %1518 = vmatprep.mubr.bf16.mxu0 %v1758_v3 }
 0x1a2   : > { %v952_v54 = vpop.f32.mrb[0].mxu0 }
 0x1a3   : > { %v953_v55 = vadd.f32 %v952_v54, %v793_v53  ;;  %v954_v56 = vpop.f32.mrb[1].mxu0 }
 0x1a4   : > { %v955_v58 = vadd.f32 %v954_v56, %v793_v53  ;;  %v956_v59 = vpop.f32.mrb[2].mxu0  ;;  %v833_v56 = vpop.permute.xlu0 %832 }
 0x1a5   : > { %v957_v60 = vadd.f32 %v956_v59, %v798_v57  ;;  %v958_v61 = vpop.f32.mrb[3].mxu0  ;;  %v1031_v0 = vmax.f32 %v953_v55, 0.0 }
 0x1a6   : > { %v959_v63 = vadd.f32 %v958_v61, %v798_v57  ;;  %v1032_v4 = vmax.f32 %v955_v58, 0.0  ;;  %v838_v61 = vpop.permute.xlu1 %837 }
 0x1a7   : > { %v1033_v2 = vmax.f32 %v957_v60, 0.0 }
 0x1a8   : > { %v1034_v6 = vmax.f32 %v959_v63, 0.0 }
 0x1a9   : > { %v1071_v7 = vpack.c.bf16 %v1033_v2, %v1031_v0 }
 0x1aa   : > { %v962_v11 = vpop.f32.mrb[4].mxu0  ;;  %v1072_v12 = vpack.c.bf16 %v1034_v6, %v1032_v4 }
 0x1ab   : > { %v963_v13 = vadd.f32 %v962_v11, %v803_v10  ;;  %v964_v14 = vpop.f32.mrb[5].mxu0 }
 0x1ac   : > { %v965_v16 = vadd.f32 %v964_v14, %v803_v10  ;;  %v966_v17 = vpop.f32.mrb[6].mxu0  ;;  %1159 = vmatprep.subr.bf16.mxu1 %v1072_v12  ;;  %v843_v14 = vpop.permute.xlu0 %842 }
 0x1ad   : > { %v967_v18 = vadd.f32 %v966_v17, %v808_v15  ;;  %v968_v19 = vpop.f32.mrb[7].mxu0  ;;  %1160 = vmatpush1.bf16.msra.mxu1 %v1071_v7  ;;  %v1035_v21 = vmax.f32 %v963_v13, 0.0 }
 0x1ae   : > { %v969_v20 = vadd.f32 %v968_v19, %v808_v15  ;;  %v1036_v23 = vmax.f32 %v965_v16, 0.0  ;;  %v848_v19 = vpop.permute.xlu1 %847 }
 0x1af   : > { %v1037_v22 = vmax.f32 %v967_v18, 0.0 }
 0x1b0   : > { %v1038_v24 = vmax.f32 %v969_v20, 0.0 }
 0x1b1   : > { %v1073_v25 = vpack.c.bf16 %v1037_v22, %v1035_v21 }
 0x1b2   : > { %v1074_v27 = vpack.c.bf16 %v1038_v24, %v1036_v23  ;;  %v972_v28 = vpop.f32.mrb[8].mxu0 }
 0x1b3   : > { %v973_v29 = vadd.f32 %v972_v28, %v813_v26  ;;  %v974_v30 = vpop.f32.mrb[9].mxu0 }
 0x1b4   : > { %v975_v32 = vadd.f32 %v974_v30, %v813_v26  ;;  %v976_v33 = vpop.f32.mrb[10].mxu0  ;;  %1161 = vmatprep.subr.bf16.mxu1 %v1074_v27  ;;  %v853_v30 = vpop.permute.xlu0 %852 }
 0x1b5   : > { %v977_v34 = vadd.f32 %v976_v33, %v818_v31  ;;  %v978_v35 = vpop.f32.mrb[11].mxu0  ;;  %1162 = vmatpush1.bf16.msra.mxu1 %v1073_v25  ;;  %v1039_v37 = vmax.f32 %v973_v29, 0.0 }
 0x1b6   : > { %v979_v36 = vadd.f32 %v978_v35, %v818_v31  ;;  %v1040_v39 = vmax.f32 %v975_v32, 0.0  ;;  %v858_v35 = vpop.permute.xlu1 %857 }
 0x1b7   : > { %v1041_v38 = vmax.f32 %v977_v34, 0.0 }
 0x1b8   : > { %v1042_v40 = vmax.f32 %v979_v36, 0.0 }
 0x1b9   : > { %v1075_v41 = vpack.c.bf16 %v1041_v38, %v1039_v37 }
 0x1ba   : > { %v1076_v43 = vpack.c.bf16 %v1042_v40, %v1040_v39  ;;  %v982_v44 = vpop.f32.mrb[12].mxu0 }
 0x1bb   : > { %v983_v45 = vadd.f32 %v982_v44, %v823_v42  ;;  %v984_v46 = vpop.f32.mrb[13].mxu0 }
 0x1bc   : > { %v985_v9 = vadd.f32 %v984_v46, %v823_v42  ;;  %v986_v47 = vpop.f32.mrb[14].mxu0  ;;  %1163 = vmatprep.subr.bf16.mxu1 %v1076_v43  ;;  %v863_v46 = vpop.permute.xlu0 %862 }
 0x1bd   : > { %v987_v48 = vadd.f32 %v986_v47, %v828_v8  ;;  %v988_v49 = vpop.f32.mrb[15].mxu0  ;;  %1164 = vmatpush1.bf16.msra.mxu1 %v1075_v41  ;;  %v1043_v51 = vmax.f32 %v983_v45, 0.0 }
 0x1be   : > { %v989_v50 = vadd.f32 %v988_v49, %v828_v8  ;;  %v1044_v53 = vmax.f32 %v985_v9, 0.0  ;;  %v868_v49 = vpop.permute.xlu1 %867 }
 0x1bf   : > { %v1045_v52 = vmax.f32 %v987_v48, 0.0 }
 0x1c0   : > { %v1046_v54 = vmax.f32 %v989_v50, 0.0 }
 0x1c1   : > { %v1077_v55 = vpack.c.bf16 %v1045_v52, %v1043_v51 }
 0x1c2   : > { %v1078_v57 = vpack.c.bf16 %v1046_v54, %v1044_v53  ;;  %v992_v58 = vpop.f32.mrb[16].mxu0 }
 0x1c3   : > { %v993_v59 = vadd.f32 %v992_v58, %v833_v56  ;;  %v994_v60 = vpop.f32.mrb[17].mxu0 }
 0x1c4   : > { %v995_v63 = vadd.f32 %v994_v60, %v833_v56  ;;  %v996_v0 = vpop.f32.mrb[18].mxu0  ;;  %1165 = vmatprep.subr.bf16.mxu1 %v1078_v57 }
 0x1c5   : > { %v997_v2 = vadd.f32 %v996_v0, %v838_v61  ;;  %v998_v4 = vpop.f32.mrb[19].mxu0  ;;  %1166 = vmatpush1.bf16.msra.mxu1 %v1077_v55  ;;  %v1047_v7 = vmax.f32 %v993_v59, 0.0  ;;  %v1742_v0 = vld [vmem:[%s2204_s5 + $0x10] sm:$0xff]  }
 0x1c6   : > { %v999_v6 = vadd.f32 %v998_v4, %v838_v61  ;;  %v1048_v11 = vmax.f32 %v995_v63, 0.0  ;;  %v1740_v61 = vld [vmem:[%s2204_s5] sm:$0xff]   ;;  %v1741_v63 = vld [vmem:[%s2204_s5 + $0x8] sm:$0xff]   ;;  %v1098_v4 = vpop.permute.xlu0 %1097 }
 0x1c7   : > { %v1049_v10 = vmax.f32 %v997_v2, 0.0  ;;  %v1743_v2 = vld [vmem:[%s2204_s5 + $0x18] sm:$0xff]  }
 0x1c8   : > { %v1050_v12 = vmax.f32 %v999_v6, 0.0 }
 0x1c9   : > { %v1079_v13 = vpack.c.bf16 %v1049_v10, %v1047_v7 }
 0x1ca   : > { %v1080_v15 = vpack.c.bf16 %v1050_v12, %v1048_v11  ;;  %v1002_v16 = vpop.f32.mrb[20].mxu0  ;;  %v1103_v11 = vpop.permute.xlu1 %1102 }
 0x1cb   : > { %v1003_v17 = vadd.f32 %v1002_v16, %v843_v14  ;;  %v1004_v18 = vpop.f32.mrb[21].mxu0 }
 0x1cc   : > { %v1005_v20 = vadd.f32 %v1004_v18, %v843_v14  ;;  %v1006_v21 = vpop.f32.mrb[22].mxu0  ;;  %1167 = vmatprep.subr.bf16.mxu1 %v1080_v15 }
 0x1cd   : > { %v1007_v22 = vadd.f32 %v1006_v21, %v848_v19  ;;  %v1008_v23 = vpop.f32.mrb[23].mxu0  ;;  %1168 = vmatpush1.bf16.msra.mxu1 %v1079_v13  ;;  %v1051_v25 = vmax.f32 %v1003_v17, 0.0 }
 0x1ce   : > { %v1009_v24 = vadd.f32 %v1008_v23, %v848_v19  ;;  %v1052_v27 = vmax.f32 %v1005_v20, 0.0 }
 0x1cf   : > { %v1053_v26 = vmax.f32 %v1007_v22, 0.0  ;;  %v1108_v22 = vpop.permute.xlu0 %1107 }
 0x1d0   : > { %v1054_v28 = vmax.f32 %v1009_v24, 0.0 }
 0x1d1   : > { %v1081_v29 = vpack.c.bf16 %v1053_v26, %v1051_v25 }
 0x1d2   : > { %v1082_v31 = vpack.c.bf16 %v1054_v28, %v1052_v27  ;;  %v1012_v32 = vpop.f32.mrb[24].mxu0  ;;  %v1113_v27 = vpop.permute.xlu1 %1112 }
 0x1d3   : > { %v1013_v33 = vadd.f32 %v1012_v32, %v853_v30  ;;  %v1014_v34 = vpop.f32.mrb[25].mxu0 }
 0x1d4   : > { %v1015_v36 = vadd.f32 %v1014_v34, %v853_v30  ;;  %v1016_v37 = vpop.f32.mrb[26].mxu0  ;;  %1169 = vmatprep.subr.bf16.mxu1 %v1082_v31 }
 0x1d5   : > { %v1017_v38 = vadd.f32 %v1016_v37, %v858_v35  ;;  %v1018_v39 = vpop.f32.mrb[27].mxu0  ;;  %1170 = vmatpush1.bf16.msra.mxu1 %v1081_v29  ;;  %v1055_v41 = vmax.f32 %v1013_v33, 0.0 }
 0x1d6   : > { %v1019_v40 = vadd.f32 %v1018_v39, %v858_v35  ;;  %v1056_v43 = vmax.f32 %v1015_v36, 0.0 }
 0x1d7   : > { %v1057_v42 = vmax.f32 %v1017_v38, 0.0  ;;  %v1118_v38 = vpop.permute.xlu0 %1117 }
 0x1d8   : > { %v1058_v44 = vmax.f32 %v1019_v40, 0.0 }
 0x1d9   : > { %v1083_v45 = vpack.c.bf16 %v1057_v42, %v1055_v41 }
 0x1da   : > { %v1084_v8 = vpack.c.bf16 %v1058_v44, %v1056_v43  ;;  %v1022_v9 = vpop.f32.mrb[28].mxu0  ;;  %v1123_v43 = vpop.permute.xlu1 %1122 }
 0x1db   : > { %v1023_v47 = vadd.f32 %v1022_v9, %v863_v46  ;;  %v1024_v48 = vpop.f32.mrb[29].mxu0 }
 0x1dc   : > { %v1025_v50 = vadd.f32 %v1024_v48, %v863_v46  ;;  %v1026_v51 = vpop.f32.mrb[30].mxu0  ;;  %1171 = vmatprep.subr.bf16.mxu1 %v1084_v8 }
 0x1dd   : > { %v1027_v52 = vadd.f32 %v1026_v51, %v868_v49  ;;  %v1028_v53 = vpop.f32.mrb[31].mxu0  ;;  %1172 = vmatpush1.bf16.msra.mxu1 %v1083_v45  ;;  %v1059_v55 = vmax.f32 %v1023_v47, 0.0 }
 0x1de   : > { %v1029_v54 = vadd.f32 %v1028_v53, %v868_v49  ;;  %v1060_v57 = vmax.f32 %v1025_v50, 0.0 }
 0x1df   : > { %v1061_v56 = vmax.f32 %v1027_v52, 0.0  ;;  %v1128_v52 = vpop.permute.xlu0 %1127 }
 0x1e0   : > { %v1062_v58 = vmax.f32 %v1029_v54, 0.0 }
 0x1e1   : > { %v1085_v59 = vpack.c.bf16 %v1061_v56, %v1059_v55 }
 0x1e2   : > { %v1086_v60 = vpack.c.bf16 %v1062_v58, %v1060_v57  ;;  %v1133_v57 = vpop.permute.xlu1 %1132 }
 0x1e4   : > { %1173 = vmatprep.subr.bf16.mxu1 %v1086_v60 }
 0x1e5   : > { %1174 = vmatpush1.bf16.msra.mxu1 %v1085_v59 }
 0x1e8   : > { %1192 = vmatmul.mubr.bf16.vlgmr.msra.gmra.mrb[0].mxu1 %v1740_v61 }
 0x1e9   : > { %1201 = vmatprep.mubr.bf16.mxu1 %v1758_v3 }
 0x1f0   : > { %1202 = vmatmul.mubr.bf16.gmra.mrb[4].mxu1 %v1741_v63 }
 0x1f1   : > { %1211 = vmatprep.mubr.bf16.mxu1 %v1758_v3 }
 0x1f8   : > { %1212 = vmatmul.mubr.bf16.gmra.mrb[8].mxu1 %v1742_v0 }
 0x1f9   : > { %1221 = vmatprep.mubr.bf16.mxu1 %v1758_v3 }
 0x200   : > { %1222 = vmatmul.mubr.bf16.gmra.mrb[12].mxu1 %v1743_v2 }
 0x201   : > { %1377 = vmatprep.mubr.bf16.mxu1 %v1758_v3 }
 0x2bb   : > { %v1193_v6 = vpop.f32.mrb[0].mxu1 }
 0x2bc   : > { %v1194_v7 = vadd.f32 %v1193_v6, %v1098_v4  ;;  %v1195_v10 = vpop.f32.mrb[1].mxu1 }
 0x2bd   : > { %v1196_v12 = vadd.f32 %v1195_v10, %v1098_v4  ;;  %v1197_v13 = vpop.f32.mrb[2].mxu1 }
 0x2be   : > { %v1198_v14 = vadd.f32 %v1197_v13, %v1103_v11  ;;  %v1199_v15 = vpop.f32.mrb[3].mxu1  ;;  %v1232_v17 = vmax.f32 %v1194_v7, 0.0  ;;  %v1746_v13 = vld [vmem:[%s2206_s7 + $0x10] sm:$0xff]  }
 0x2bf   : > { %v1200_v16 = vadd.f32 %v1199_v15, %v1103_v11  ;;  %v1233_v19 = vmax.f32 %v1196_v12, 0.0  ;;  %v1744_v11 = vld [vmem:[%s2206_s7] sm:$0xff]   ;;  %v1745_v12 = vld [vmem:[%s2206_s7 + $0x8] sm:$0xff]   ;;  %v1275_v15 = vpop.permute.xlu0 %1274 }
 0x2c0   : > { %v1234_v18 = vmax.f32 %v1198_v14, 0.0  ;;  %v1747_v14 = vld [vmem:[%s2206_s7 + $0x18] sm:$0xff]  }
 0x2c1   : > { %v1235_v20 = vmax.f32 %v1200_v16, 0.0 }
 0x2c2   : > { %v1256_v21 = vpack.c.bf16 %v1234_v18, %v1232_v17 }
 0x2c3   : > { %v1257_v23 = vpack.c.bf16 %v1235_v20, %v1233_v19  ;;  %v1203_v24 = vpop.f32.mrb[4].mxu1  ;;  %v1280_v19 = vpop.permute.xlu1 %1279 }
 0x2c4   : > { %v1204_v25 = vadd.f32 %v1203_v24, %v1108_v22  ;;  %v1205_v26 = vpop.f32.mrb[5].mxu1 }
 0x2c5   : > { %v1206_v28 = vadd.f32 %v1205_v26, %v1108_v22  ;;  %v1207_v29 = vpop.f32.mrb[6].mxu1  ;;  %1345 = vmatprep.subr.bf16.mxu1 %v1257_v23 }
 0x2c6   : > { %v1208_v30 = vadd.f32 %v1207_v29, %v1113_v27  ;;  %v1209_v31 = vpop.f32.mrb[7].mxu1  ;;  %1346 = vmatpush1.bf16.msra.mxu1 %v1256_v21  ;;  %v1236_v33 = vmax.f32 %v1204_v25, 0.0 }
 0x2c7   : > { %v1210_v32 = vadd.f32 %v1209_v31, %v1113_v27  ;;  %v1237_v35 = vmax.f32 %v1206_v28, 0.0 }
 0x2c8   : > { %v1238_v34 = vmax.f32 %v1208_v30, 0.0  ;;  %v1285_v30 = vpop.permute.xlu0 %1284 }
 0x2c9   : > { %v1239_v36 = vmax.f32 %v1210_v32, 0.0 }
 0x2ca   : > { %v1258_v37 = vpack.c.bf16 %v1238_v34, %v1236_v33  ;;  %v1290_v34 = vpop.permute.xlu1 %1289 }
 0x2cb   : > { %v1259_v39 = vpack.c.bf16 %v1239_v36, %v1237_v35  ;;  %v1213_v40 = vpop.f32.mrb[8].mxu1 }
 0x2cc   : > { %v1214_v41 = vadd.f32 %v1213_v40, %v1118_v38  ;;  %v1215_v42 = vpop.f32.mrb[9].mxu1 }
 0x2cd   : > { %v1216_v44 = vadd.f32 %v1215_v42, %v1118_v38  ;;  %v1217_v45 = vpop.f32.mrb[10].mxu1  ;;  %1347 = vmatprep.subr.bf16.mxu1 %v1259_v39 }
 0x2ce   : > { %v1218_v46 = vadd.f32 %v1217_v45, %v1123_v43  ;;  %v1219_v8 = vpop.f32.mrb[11].mxu1  ;;  %1348 = vmatpush1.bf16.msra.mxu1 %v1258_v37  ;;  %v1240_v47 = vmax.f32 %v1214_v41, 0.0  ;;  %v1295_v45 = vpop.permute.xlu0 %1294 }
 0x2cf   : > { %v1220_v9 = vadd.f32 %v1219_v8, %v1123_v43  ;;  %v1241_v49 = vmax.f32 %v1216_v44, 0.0 }
 0x2d0   : > { %v1242_v48 = vmax.f32 %v1218_v46, 0.0 }
 0x2d1   : > { %v1243_v50 = vmax.f32 %v1220_v9, 0.0 }
 0x2d2   : > { %v1260_v51 = vpack.c.bf16 %v1242_v48, %v1240_v47  ;;  %v1300_v48 = vpop.permute.xlu1 %1299 }
 0x2d3   : > { %v1261_v53 = vpack.c.bf16 %v1243_v50, %v1241_v49  ;;  %v1223_v54 = vpop.f32.mrb[12].mxu1 }
 0x2d4   : > { %v1224_v55 = vadd.f32 %v1223_v54, %v1128_v52  ;;  %v1225_v56 = vpop.f32.mrb[13].mxu1 }
 0x2d5   : > { %v1226_v58 = vadd.f32 %v1225_v56, %v1128_v52  ;;  %v1227_v59 = vpop.f32.mrb[14].mxu1  ;;  %1349 = vmatprep.subr.bf16.mxu1 %v1261_v53 }
 0x2d6   : > { %v1228_v60 = vadd.f32 %v1227_v59, %v1133_v57  ;;  %v1229_v61 = vpop.f32.mrb[15].mxu1  ;;  %1350 = vmatpush1.bf16.msra.mxu1 %v1260_v51  ;;  %v1244_v0 = vmax.f32 %v1224_v55, 0.0  ;;  %v1305_v59 = vpop.permute.xlu0 %1304 }
 0x2d7   : > { %v1230_v63 = vadd.f32 %v1229_v61, %v1133_v57  ;;  %v1245_v4 = vmax.f32 %v1226_v58, 0.0 }
 0x2d8   : > { %v1246_v2 = vmax.f32 %v1228_v60, 0.0 }
 0x2d9   : > { %v1247_v6 = vmax.f32 %v1230_v63, 0.0 }
 0x2da   : > { %v1262_v7 = vpack.c.bf16 %v1246_v2, %v1244_v0  ;;  %v1310_v2 = vpop.permute.xlu1 %1309 }
 0x2db   : > { %v1263_v10 = vpack.c.bf16 %v1247_v6, %v1245_v4 }
 0x2dd   : > { %1351 = vmatprep.subr.bf16.mxu1 %v1263_v10 }
 0x2de   : > { %1352 = vmatpush1.bf16.msra.mxu1 %v1262_v7 }
 0x2e1   : > { %1702 = vmatmul.mubr.msk.bf16.vlgmr.msra.gmra.mrb[16].mxu1 %vm1332_vm0, %v1744_v11 }
 0x2e2   : > { %1387 = vmatprep.mubr.bf16.mxu1 %v1758_v3 }
 0x2e9   : > { %1703 = vmatmul.mubr.msk.bf16.gmra.mrb[20].mxu1 %vm1332_vm0, %v1745_v12 }
 0x2ea   : > { %1397 = vmatprep.mubr.bf16.mxu1 %v1758_v3 }
 0x2f1   : > { %1704 = vmatmul.mubr.msk.bf16.gmra.mrb[24].mxu1 %vm1332_vm0, %v1746_v13 }
 0x2f2   : > { %1407 = vmatprep.mubr.bf16.mxu1 %v1758_v3 }
 0x2f9   : > { %1705 = vmatmul.mubr.msk.bf16.gmra.mrb[28].mxu1 %vm1332_vm0, %v1747_v14 }
 0x2fa   : > { %1528 = vmatprep.mubr.bf16.mxu1 %v1758_v3 }
 0x3b4   : > { %v1379_v16 = vpop.f32.mrb[16].mxu1 }
 0x3b5   : > { %v1380_v17 = vadd.f32 %v1379_v16, %v1275_v15  ;;  %v1381_v18 = vpop.f32.mrb[17].mxu1 }
 0x3b6   : > { %v1382_v20 = vadd.f32 %v1381_v18, %v1275_v15  ;;  %v1383_v21 = vpop.f32.mrb[18].mxu1  ;;  %v1748_v18 = vld [vmem:[%s2208_s9] sm:$0xff]  }
 0x3b7   : > { %v1384_v22 = vadd.f32 %v1383_v21, %v1280_v19  ;;  %v1385_v23 = vpop.f32.mrb[19].mxu1  ;;  %v1418_v25 = vmax.f32 %v1380_v17, 0.0  ;;  %v1458_v21 = vpop.permute.xlu1 %1457 }
 0x3b8   : > { %v1386_v24 = vadd.f32 %v1385_v23, %v1280_v19  ;;  %v1419_v27 = vmax.f32 %v1382_v20, 0.0  ;;  %v1749_v19 = vld [vmem:[%s2208_s9 + $0x8] sm:$0xff]   ;;  %v1453_v20 = vpop.permute.xlu0 %1452 }
 0x3b9   : > { %v1420_v26 = vmax.f32 %v1384_v22, 0.0 }
 0x3ba   : > { %v1421_v28 = vmax.f32 %v1386_v24, 0.0 }
 0x3bb   : > { %v1438_v29 = vpack.c.bf16 %v1420_v26, %v1418_v25  ;;  %v1468_v23 = vpop.permute.xlu1 %1467 }
 0x3bc   : > { %v1439_v31 = vpack.c.bf16 %v1421_v28, %v1419_v27  ;;  %v1389_v32 = vpop.f32.mrb[20].mxu1  ;;  %v1463_v22 = vpop.permute.xlu0 %1462 }
 0x3bd   : > { %v1390_v33 = vadd.f32 %v1389_v32, %v1285_v30  ;;  %v1391_v3 = vpop.f32.mrb[21].mxu1 }
 0x3be   : > { %v1392_v35 = vadd.f32 %v1391_v3, %v1285_v30  ;;  %v1393_v36 = vpop.f32.mrb[22].mxu1  ;;  %1486 = vmatprep.subr.bf16.mxu0 %v1439_v31  ;;  %1712 = vmatprep.subr.bf16.mxu1 %v1439_v31 }
 0x3bf   : > { %v1394_v37 = vadd.f32 %v1393_v36, %v1290_v34  ;;  %v1395_v38 = vpop.f32.mrb[23].mxu1  ;;  %1487 = vmatpush1.bf16.msra.mxu0 %v1438_v29  ;;  %1716 = vmatpush1.bf16.msra.mxu1 %v1438_v29  ;;  %v1422_v40 = vmax.f32 %v1390_v33, 0.0 }
 0x3c0   : > { %v1396_v39 = vadd.f32 %v1395_v38, %v1290_v34  ;;  %v1423_v42 = vmax.f32 %v1392_v35, 0.0  ;;  %v1554_v24 = vpop.permute.xlu0 %1553 }
 0x3c1   : > { %v1424_v41 = vmax.f32 %v1394_v37, 0.0 }
 0x3c2   : > { %v1425_v43 = vmax.f32 %v1396_v39, 0.0  ;;  %v1559_v39 = vpop.permute.xlu1 %1558 }
 0x3c3   : > { %v1440_v44 = vpack.c.bf16 %v1424_v41, %v1422_v40 }
 0x3c4   : > { %v1441_v46 = vpack.c.bf16 %v1425_v43, %v1423_v42  ;;  %v1399_v8 = vpop.f32.mrb[24].mxu1 }
 0x3c5   : > { %v1400_v9 = vadd.f32 %v1399_v8, %v1295_v45  ;;  %v1401_v47 = vpop.f32.mrb[25].mxu1 }
 0x3c6   : > { %v1402_v49 = vadd.f32 %v1401_v47, %v1295_v45  ;;  %v1403_v50 = vpop.f32.mrb[26].mxu1  ;;  %1488 = vmatprep.subr.bf16.mxu0 %v1441_v46  ;;  %1713 = vmatprep.subr.bf16.mxu1 %v1441_v46 }
 0x3c7   : > { %v1404_v51 = vadd.f32 %v1403_v50, %v1300_v48  ;;  %v1405_v52 = vpop.f32.mrb[27].mxu1  ;;  %1489 = vmatpush1.bf16.msra.mxu0 %v1440_v44  ;;  %1717 = vmatpush1.bf16.msra.mxu1 %v1440_v44  ;;  %v1426_v54 = vmax.f32 %v1400_v9, 0.0 }
 0x3c8   : > { %v1406_v53 = vadd.f32 %v1405_v52, %v1300_v48  ;;  %v1427_v56 = vmax.f32 %v1402_v49, 0.0  ;;  %v1564_v48 = vpop.permute.xlu0 %1563 }
 0x3c9   : > { %v1428_v55 = vmax.f32 %v1404_v51, 0.0 }
 0x3ca   : > { %v1429_v57 = vmax.f32 %v1406_v53, 0.0 }
 0x3cb   : > { %v1442_v58 = vpack.c.bf16 %v1428_v55, %v1426_v54  ;;  %v1569_v54 = vpop.permute.xlu1 %1568 }
 0x3cc   : > { %v1443_v60 = vpack.c.bf16 %v1429_v57, %v1427_v56  ;;  %v1409_v61 = vpop.f32.mrb[28].mxu1 }
 0x3cd   : > { %v1410_v63 = vadd.f32 %v1409_v61, %v1305_v59  ;;  %v1411_v0 = vpop.f32.mrb[29].mxu1 }
 0x3ce   : > { %v1412_v4 = vadd.f32 %v1411_v0, %v1305_v59  ;;  %v1413_v6 = vpop.f32.mrb[30].mxu1  ;;  %1490 = vmatprep.subr.bf16.mxu0 %v1443_v60  ;;  %1714 = vmatprep.subr.bf16.mxu1 %v1443_v60 }
 0x3cf   : > { %v1414_v7 = vadd.f32 %v1413_v6, %v1310_v2  ;;  %v1415_v10 = vpop.f32.mrb[31].mxu1  ;;  %1491 = vmatpush1.bf16.msra.mxu0 %v1442_v58  ;;  %1718 = vmatpush1.bf16.msra.mxu1 %v1442_v58  ;;  %v1430_v12 = vmax.f32 %v1410_v63, 0.0 }
 0x3d0   : > { %v1416_v11 = vadd.f32 %v1415_v10, %v1310_v2  ;;  %v1431_v14 = vmax.f32 %v1412_v4, 0.0 }
 0x3d1   : > { %v1432_v13 = vmax.f32 %v1414_v7, 0.0 }
 0x3d2   : > { %v1433_v15 = vmax.f32 %v1416_v11, 0.0  ;;  %v1759_v11 = vmov 1966171168  }
 0x3d3   : > { %v1444_v16 = vpack.c.bf16 %v1432_v13, %v1430_v12  ;;  %v1613_v12 = vunpack.c.l.s4 %v1759_v11 }
 0x3d4   : > { %v1445_v17 = vpack.c.bf16 %v1433_v15, %v1431_v14  ;;  %v1601_v14 = vpop.permute.xlu0 %1600 }
 0x3d6   : > { %1492 = vmatprep.subr.bf16.mxu0 %v1445_v17  ;;  %1715 = vmatprep.subr.bf16.mxu1 %v1445_v17 }
 0x3d7   : > { %1493 = vmatpush1.bf16.msra.mxu0 %v1444_v16  ;;  %1719 = vmatpush1.bf16.msra.mxu1 %v1444_v16 }
 0x3da   : > { %1708 = vmatmul.mubr.msk.bf16.vlgmr.msra.gmra.mrb[32].mxu0 %vm1332_vm0, %v1748_v18  ;;  %1709 = vmatmul.mubr.msk.bf16.vlgmr.msra.gmra.mrb[32].mxu1 %vm1332_vm0, %v1749_v19  ;;  %v1614_v18 = vunpack.c.0.s8 %v1613_v12  ;;  %v1606_v19 = vrot.slane %v1601_v14, %v542_v5 }
 0x4ad   : > { %v1520_v25 = vpop.f32.mrb[32].mxu0  ;;  %v1530_v26 = vpop.f32.mrb[32].mxu1 }
 0x4ae   : > { %v1521_v27 = vadd.f32 %v1520_v25, %v1453_v20  ;;  %v1531_v28 = vadd.f32 %v1530_v26, %v1463_v22  ;;  %v1522_v29 = vpop.f32.mrb[33].mxu0  ;;  %v1532_v30 = vpop.f32.mrb[33].mxu1 }
 0x4af   : > { %v1523_v31 = vadd.f32 %v1522_v29, %v1453_v20  ;;  %v1533_v32 = vadd.f32 %v1532_v30, %v1463_v22  ;;  %v1524_v33 = vpop.f32.mrb[34].mxu0  ;;  %v1534_v3 = vpop.f32.mrb[34].mxu1 }
 0x4b0   : > { %v1539_v34 = vmax.f32 %v1521_v27, 0.0  ;;  %v1525_v35 = vadd.f32 %v1524_v33, %v1458_v21  ;;  %v1535_v36 = vadd.f32 %v1534_v3, %v1468_v23  ;;  %v1526_v37 = vpop.f32.mrb[35].mxu0  ;;  %v1536_v38 = vpop.f32.mrb[35].mxu1  ;;  %v1543_v43 = vmax.f32 %v1531_v28, 0.0 }
 0x4b1   : > { %v1540_v40 = vmax.f32 %v1523_v31, 0.0  ;;  %v1527_v41 = vadd.f32 %v1526_v37, %v1458_v21  ;;  %v1537_v42 = vadd.f32 %v1536_v38, %v1468_v23  ;;  %v1544_v45 = vmax.f32 %v1533_v32, 0.0 }
 0x4b2   : > { %v1541_v44 = vmax.f32 %v1525_v35, 0.0  ;;  %v1571_v8 = vmul.f32 %v1554_v24, %v1539_v34  ;;  %v1545_v47 = vmax.f32 %v1535_v36, 0.0  ;;  %v1575_v52 = vmul.f32 %v1564_v48, %v1543_v43 }
 0x4b3   : > { %v1542_v46 = vmax.f32 %v1527_v41, 0.0  ;;  %v1572_v49 = vmul.f32 %v1554_v24, %v1540_v40  ;;  %v1546_v51 = vmax.f32 %v1537_v42, 0.0  ;;  %v1576_v55 = vmul.f32 %v1564_v48, %v1544_v45 }
 0x4b4   : > { %v1573_v9 = vmul.f32 %v1559_v39, %v1541_v44  ;;  %v1577_v57 = vmul.f32 %v1569_v54, %v1545_v47  ;;  %v1617_v24 = vsub.s32 %v1614_v18, %v2036_v1 }
 0x4b5   : > { %v1574_v50 = vmul.f32 %v1559_v39, %v1542_v46  ;;  %v1578_v59 = vmul.f32 %v1569_v54, %v1546_v51 }
 0x4b6   : > { %v1579_v53 = vadd.f32 %v1573_v9, %v1571_v8 }
 0x4b7   : > { %v1588_v56 = vadd.f32 %v1574_v50, %v1572_v49 }
 0x4b8   : > { %v1580_v58 = vadd.f32 %v1579_v53, %v1575_v52 }
 0x4b9   : > { %v1589_v60 = vadd.f32 %v1588_v56, %v1576_v55 }
 0x4ba   : > { %v1581_v61 = vadd.f32 %v1580_v58, %v1577_v57 }
 0x4bb   : > { %v1590_v63 = vadd.f32 %v1589_v60, %v1578_v59 }
 0x4bc   : > { %v1582_v0 = vrot.slane %v1581_v61, 4 }
 0x4bd   : > { %v1591_v2 = vrot.slane %v1590_v63, 4 }
 0x4be   : > { %v1583_v4 = vadd.f32 %v1582_v0, %v1581_v61 }
 0x4bf   : > { %v1592_v6 = vadd.f32 %v1591_v2, %v1590_v63 }
 0x4c0   : > { %v1584_v7 = vrot.slane %v1583_v4, 2 }
 0x4c1   : > { %v1593_v10 = vrot.slane %v1592_v6, 2 }
 0x4c2   : > { %v1585_v13 = vadd.f32 %v1584_v7, %v1583_v4 }
 0x4c3   : > { %v1594_v15 = vadd.f32 %v1593_v10, %v1592_v6 }
 0x4c4   : > { %v1586_v16 = vrot.slane %v1585_v13, 1 }
 0x4c5   : > { %v1595_v17 = vrot.slane %v1594_v15, 1 }
 0x4c6   : > { %v1587_v20 = vadd.f32 %v1586_v16, %v1585_v13 }
 0x4c7   : > { %v1596_v21 = vadd.f32 %v1595_v17, %v1594_v15 }
 0x4c8   : > { %v1607_v22 = vadd.f32 %v1606_v19, %v1587_v20 }
 0x4c9   : > { %v1608_v23 = vadd.f32 %v1606_v19, %v1596_v21 }
 0x4cb   : > { %v1611_v25 = vcombine.low %v1607_v22, %v1608_v23 }
 0x4cd   : > { %v1618_v26 = vrot.slane %v1611_v25, %v1617_v24 }
 0x4cf   : > { %v1625_v27 = vrot.slane %v1618_v26, %v1617_v24 }
 0x4d1   : > { %1631 = vst.msk [vmem:[%s439_s20] sm:$0x3] %vm1629_vm1, %v1625_v27 }
 0x4d2 PF: > { %s25_s27 = sadd.s32 1, %s1756_s27  }
 0x4d3   : > { %p22_p4 = scmp.ge.s32.totalorder %s25_s27, 6  }
 0x4d5   :  { %24 = sbr.rel (!%p22_p4) target bundleno = 3 (0x3), region = 102 }

</bundles_post_ra>
